<compile_context>
chip_gen: v7x
topology: tpu7x:2x2x1
jax: 0.10.0
libtpu: 0.0.40
codegen_flags: <defaults>
</compile_context>

<pallas_src>
import functools

import jax
import jax.numpy as jnp
from jax import lax
from jax.experimental import pallas as pl
from jax.experimental.pallas import tpu as pltpu

_LANES = 128
_SUBLANES = 8
_SLAB = _SUBLANES * _LANES  # 1024 elements = one f32 vreg


def _nps_kernel(coef_ref, patch_ref, out_ref, *,
                tile_slabs: int, total_slabs: int,
                num_colors: int, num_ch: int, g_inner: int):
    # coef_ref:  (P, C+1) f32 in SMEM: [:, :C] = -2*(col-1e-6), [:, C] = ||col-1e-6||^2 + 1e-6
    # patch_ref: (C, tile_slabs, 8, 128) f32 VMEM tile of the flattened patch
    # out_ref:   (8, 128) f32 per-outer-block partial sums (resident across inner axis)
    o = pl.program_id(0)            # parallel (megacore) axis
    i = pl.program_id(1)            # arbitrary (accumulation) axis
    blk = o * g_inner + i           # logical block index
    # Number of valid (8,128) slabs in this tile (last tile may be ragged;
    # rows past it are never read, so no per-element mask is needed).
    slabs_here = jnp.minimum(total_slabs - blk * tile_slabs, tile_slabs)

    # Hoist all SMEM scalar coefficient reads out of the slab loop.
    m2 = [[coef_ref[p, c] for c in range(num_ch)] for p in range(num_colors)]
    cn = [coef_ref[p, num_ch] for p in range(num_colors)]

    def slab_body(s, carry):
        # One f32 vreg per channel; ~8 live vregs total -> no spills.
        x = [patch_ref[c, s] for c in range(num_ch)]          # each (8, 128)
        sumsq = x[0] * x[0]
        for c in range(1, num_ch):
            sumsq = sumsq + x[c] * x[c]
        m = None
        for p in range(num_colors):                            # static unroll
            d = x[0] * m2[p][0]
            for c in range(1, num_ch):
                d = d + x[c] * m2[p][c]
            d = d + cn[p]                                      # cross term + ||col||^2 + 1e-6
            m = d if m is None else jnp.minimum(m, d)
        # True d2 >= 1e-6; clamp guards against cancellation in the expanded
        # form when a pixel almost exactly matches a printable color.
        d2 = jnp.maximum(sumsq + m, jnp.float32(1e-6))
        return carry + jnp.sqrt(d2)                            # single EUP sqrt / element

    part = lax.fori_loop(0, slabs_here, slab_body,
                         jnp.zeros((_SUBLANES, _LANES), jnp.float32))

    @pl.when(i == 0)
    def _():
        out_ref[...] = part

    @pl.when(i > 0)
    def _():
        out_ref[...] += part


def nps_loss(adv_patch: jax.Array, colors: jax.Array,
             *, tile_rows: int = 1024, outer_parallel: int = 2) -> jax.Array:
    """adv_patch: (C, H, W) float; colors: (P, C) printable RGB triplets in [0,1]."""
    C, H, W = adv_patch.shape
    P, Cc = colors.shape
    assert Cc == C
    adv = adv_patch.astype(jnp.float32)
    colors = colors.astype(jnp.float32)
    n = H * W

    # Lane-dense layout: flatten HxW and pad (zeros) only to a multiple of
    # 8*128 so the patch reshapes to (C, S, 8, 128). The zero pads' exact
    # contribution is subtracted analytically below (no in-kernel mask).
    n_pad = ((n + _SLAB - 1) // _SLAB) * _SLAB
    flat = adv.reshape(C, n)
    if n_pad != n:
        flat = jnp.pad(flat, ((0, 0), (0, n_pad - n)))
    S = n_pad // _SLAB                                  # total (8,128) slabs
    tiles = flat.reshape(C, S, _SUBLANES, _LANES)

    # Tile size in slabs; re-derive it so the grid splits evenly across
    # `outer_parallel` TensorCores (v7x megacore) whenever there is enough work.
    ts_max = max(1, min(tile_rows // _SUBLANES, S))
    g0 = -(-S // ts_max)                                # cdiv
    g_total = ((g0 + outer_parallel - 1) // outer_parallel) * outer_parallel
    ts = -(-S // g_total)
    g = -(-S // ts)
    if g >= outer_parallel and g % outer_parallel == 0:
        g_outer = outer_parallel
    else:
        g_outer = 1                                     # tiny patch: one core is plenty
    g_inner = g // g_outer

    # Expanded-square color coefficients (folds the +1e-6 of the reference):
    #   d2 = sumsq(x) + min_p( sum_c x_c * (-2*col'_c) + ||col'||^2 + 1e-6 ),  col' = col - 1e-6
    colp = colors - jnp.float32(1e-6)                               # (P, C)
    cnorm = jnp.sum(colp * colp, axis=1, keepdims=True) + jnp.float32(1e-6)
    coeffs = jnp.concatenate([jnp.float32(-2.0) * colp, cnorm], axis=1)  # (P, C+1)

    kernel = functools.partial(
        _nps_kernel, tile_slabs=ts, total_slabs=S,
        num_colors=P, num_ch=C, g_inner=g_inner)

    out = pl.pallas_call(
        kernel,
        out_shape=jax.ShapeDtypeStruct((g_outer * _SUBLANES, _LANES), jnp.float32),
        grid_spec=pltpu.PrefetchScalarGridSpec(
            num_scalar_prefetch=0,
            grid=(g_outer, g_inner),
            in_specs=[
                # Small (P, C+1) coefficient table lives in SMEM (scalar reads).
                pl.BlockSpec(memory_space=pltpu.MemorySpace.SMEM),
                pl.BlockSpec((C, ts, _SUBLANES, _LANES),
                             lambda o, i: (0, o * g_inner + i, 0, 0)),
            ],
            out_specs=pl.BlockSpec((_SUBLANES, _LANES), lambda o, i: (o, 0)),
        ),
        compiler_params=pltpu.CompilerParams(
            dimension_semantics=("parallel", "arbitrary")),
    )(coeffs, tiles)

    total = jnp.sum(out)
    if n_pad != n:
        # Each zero-padded pixel contributes min_p sqrt(||col'||^2 + 1e-6).
        pad_dist = jnp.min(jnp.sqrt(cnorm[:, 0]))
        total = total - jnp.float32(n_pad - n) * pad_dist
    return total / jnp.float32(adv_patch.size)


def nps_loss_from_printability_array(adv_patch: jax.Array,
                                     printability_array: jax.Array) -> jax.Array:
    """Accepts the module-style (P, C, H, W) parameter; only the colors are used."""
    colors = printability_array[:, :, 0, 0]
    return nps_loss(adv_patch, colors)


def make_printability_array(colors: jax.Array, size) -> jax.Array:
    """Mirror of NPSLoss.get_printability_array: (P, C) colors -> (P, C, H, W)."""
    # TODO(synk): CSV parsing from triplet_scores_fpath is replaced by an in-script color table.
    p_h, p_w = size
    return jnp.broadcast_to(colors[:, :, None, None],
                            (colors.shape[0], colors.shape[1], p_h, p_w)).astype(jnp.float32)


def nps_loss_ref(adv_patch, printability_array):
    d = adv_patch[None] - printability_array + 1e-6
    d = jnp.sum(d * d, axis=1) + 1e-6
    d = jnp.sqrt(d)
    m = jnp.min(d, axis=0)
    return jnp.sum(m) / adv_patch.size


if __name__ == "__main__":
    key = jax.random.PRNGKey(0)
    k_patch, k_colors, k_extra = jax.random.split(key, 3)

    P = 8  # number of printable RGB triplets (synthetic in-script palette)
    colors = jax.random.uniform(k_colors, (P, 3), dtype=jnp.float32)

    # Small shapes exercising: single-tile + lane pad, no-pad, and the
    # multi-block / megacore-split / ragged-last-tile paths.
    for (H, W) in [(16, 16), (32, 32), (48, 48)]:
        kp = jax.random.fold_in(k_patch, H)
        adv = jax.random.uniform(kp, (3, H, W), dtype=jnp.float32)
        pa = make_printability_array(colors, (H, W))
        out = jax.block_until_ready(nps_loss(adv, colors))
        ref = nps_loss_ref(adv, pa)
        assert jnp.allclose(out, ref, rtol=3e-4, atol=1e-5), ((H, W), out, ref)

    # Module-style entry point (printability_array parameter like the nn.Module).
    adv = jax.random.uniform(k_extra, (3, 16, 16), dtype=jnp.float32)
    pa = make_printability_array(colors, (16, 16))
    out2 = jax.block_until_ready(nps_loss_from_printability_array(adv, pa))
    ref2 = nps_loss_ref(adv, pa)
    assert jnp.allclose(out2, ref2, rtol=3e-4, atol=1e-5), (out2, ref2)

    print("KERNEL_OK")
</pallas_src>

<mosaic_0001>
module attributes {stable_mosaic.version = 11 : i64} {
  func.func @_nps_kernel(%arg0: i32, %arg1: i32, %arg2: memref<8x4xf32, #tpu.memory_space<smem>>, %arg3: memref<3x1x8x128xf32, #tpu.memory_space<vmem>>, %arg4: memref<8x128xf32, #tpu.memory_space<vmem>>) attributes {dimension_semantics = [#tpu.dimension_semantics<parallel>, #tpu.dimension_semantics<arbitrary>], iteration_bounds = array<i64: 1, 1>, scalar_prefetch = 0 : i64, scratch_operands = 0 : i64, tpu.core_type = #tpu.core_type<tc>, window_params = [{transform_indices = @transform_0, window_bounds = array<i64: 8, 4>}, {transform_indices = @transform_1, window_bounds = array<i64: 3, 1, 8, 128>}, {transform_indices = @transform_2, window_bounds = array<i64: 8, 128>}]} {
    %c1_i32 = arith.constant 1 : i32
    %0 = arith.muli %arg0, %c1_i32 : i32
    %1 = arith.addi %0, %arg1 : i32
    %c1_i32_0 = arith.constant 1 : i32
    %2 = arith.muli %1, %c1_i32_0 : i32
    %c1_i32_1 = arith.constant 1 : i32
    %3 = arith.subi %c1_i32_1, %2 : i32
    %c1_i32_2 = arith.constant 1 : i32
    %4 = arith.minsi %3, %c1_i32_2 : i32
    %c0 = arith.constant 0 : index
    %c0_3 = arith.constant 0 : index
    %5 = memref.load %arg2[%c0, %c0_3] : memref<8x4xf32, #tpu.memory_space<smem>>
    %c0_4 = arith.constant 0 : index
    %c1 = arith.constant 1 : index
    %6 = memref.load %arg2[%c0_4, %c1] : memref<8x4xf32, #tpu.memory_space<smem>>
    %c0_5 = arith.constant 0 : index
    %c2 = arith.constant 2 : index
    %7 = memref.load %arg2[%c0_5, %c2] : memref<8x4xf32, #tpu.memory_space<smem>>
    %c1_6 = arith.constant 1 : index
    %c0_7 = arith.constant 0 : index
    %8 = memref.load %arg2[%c1_6, %c0_7] : memref<8x4xf32, #tpu.memory_space<smem>>
    %c1_8 = arith.constant 1 : index
    %c1_9 = arith.constant 1 : index
    %9 = memref.load %arg2[%c1_8, %c1_9] : memref<8x4xf32, #tpu.memory_space<smem>>
    %c1_10 = arith.constant 1 : index
    %c2_11 = arith.constant 2 : index
    %10 = memref.load %arg2[%c1_10, %c2_11] : memref<8x4xf32, #tpu.memory_space<smem>>
    %c2_12 = arith.constant 2 : index
    %c0_13 = arith.constant 0 : index
    %11 = memref.load %arg2[%c2_12, %c0_13] : memref<8x4xf32, #tpu.memory_space<smem>>
    %c2_14 = arith.constant 2 : index
    %c1_15 = arith.constant 1 : index
    %12 = memref.load %arg2[%c2_14, %c1_15] : memref<8x4xf32, #tpu.memory_space<smem>>
    %c2_16 = arith.constant 2 : index
    %c2_17 = arith.constant 2 : index
    %13 = memref.load %arg2[%c2_16, %c2_17] : memref<8x4xf32, #tpu.memory_space<smem>>
    %c3 = arith.constant 3 : index
    %c0_18 = arith.constant 0 : index
    %14 = memref.load %arg2[%c3, %c0_18] : memref<8x4xf32, #tpu.memory_space<smem>>
    %c3_19 = arith.constant 3 : index
    %c1_20 = arith.constant 1 : index
    %15 = memref.load %arg2[%c3_19, %c1_20] : memref<8x4xf32, #tpu.memory_space<smem>>
    %c3_21 = arith.constant 3 : index
    %c2_22 = arith.constant 2 : index
    %16 = memref.load %arg2[%c3_21, %c2_22] : memref<8x4xf32, #tpu.memory_space<smem>>
    %c4 = arith.constant 4 : index
    %c0_23 = arith.constant 0 : index
    %17 = memref.load %arg2[%c4, %c0_23] : memref<8x4xf32, #tpu.memory_space<smem>>
    %c4_24 = arith.constant 4 : index
    %c1_25 = arith.constant 1 : index
    %18 = memref.load %arg2[%c4_24, %c1_25] : memref<8x4xf32, #tpu.memory_space<smem>>
    %c4_26 = arith.constant 4 : index
    %c2_27 = arith.constant 2 : index
    %19 = memref.load %arg2[%c4_26, %c2_27] : memref<8x4xf32, #tpu.memory_space<smem>>
    %c5 = arith.constant 5 : index
    %c0_28 = arith.constant 0 : index
    %20 = memref.load %arg2[%c5, %c0_28] : memref<8x4xf32, #tpu.memory_space<smem>>
    %c5_29 = arith.constant 5 : index
    %c1_30 = arith.constant 1 : index
    %21 = memref.load %arg2[%c5_29, %c1_30] : memref<8x4xf32, #tpu.memory_space<smem>>
    %c5_31 = arith.constant 5 : index
    %c2_32 = arith.constant 2 : index
    %22 = memref.load %arg2[%c5_31, %c2_32] : memref<8x4xf32, #tpu.memory_space<smem>>
    %c6 = arith.constant 6 : index
    %c0_33 = arith.constant 0 : index
    %23 = memref.load %arg2[%c6, %c0_33] : memref<8x4xf32, #tpu.memory_space<smem>>
    %c6_34 = arith.constant 6 : index
    %c1_35 = arith.constant 1 : index
    %24 = memref.load %arg2[%c6_34, %c1_35] : memref<8x4xf32, #tpu.memory_space<smem>>
    %c6_36 = arith.constant 6 : index
    %c2_37 = arith.constant 2 : index
    %25 = memref.load %arg2[%c6_36, %c2_37] : memref<8x4xf32, #tpu.memory_space<smem>>
    %c7 = arith.constant 7 : index
    %c0_38 = arith.constant 0 : index
    %26 = memref.load %arg2[%c7, %c0_38] : memref<8x4xf32, #tpu.memory_space<smem>>
    %c7_39 = arith.constant 7 : index
    %c1_40 = arith.constant 1 : index
    %27 = memref.load %arg2[%c7_39, %c1_40] : memref<8x4xf32, #tpu.memory_space<smem>>
    %c7_41 = arith.constant 7 : index
    %c2_42 = arith.constant 2 : index
    %28 = memref.load %arg2[%c7_41, %c2_42] : memref<8x4xf32, #tpu.memory_space<smem>>
    %c0_43 = arith.constant 0 : index
    %c3_44 = arith.constant 3 : index
    %29 = memref.load %arg2[%c0_43, %c3_44] : memref<8x4xf32, #tpu.memory_space<smem>>
    %c1_45 = arith.constant 1 : index
    %c3_46 = arith.constant 3 : index
    %30 = memref.load %arg2[%c1_45, %c3_46] : memref<8x4xf32, #tpu.memory_space<smem>>
    %c2_47 = arith.constant 2 : index
    %c3_48 = arith.constant 3 : index
    %31 = memref.load %arg2[%c2_47, %c3_48] : memref<8x4xf32, #tpu.memory_space<smem>>
    %c3_49 = arith.constant 3 : index
    %c3_50 = arith.constant 3 : index
    %32 = memref.load %arg2[%c3_49, %c3_50] : memref<8x4xf32, #tpu.memory_space<smem>>
    %c4_51 = arith.constant 4 : index
    %c3_52 = arith.constant 3 : index
    %33 = memref.load %arg2[%c4_51, %c3_52] : memref<8x4xf32, #tpu.memory_space<smem>>
    %c5_53 = arith.constant 5 : index
    %c3_54 = arith.constant 3 : index
    %34 = memref.load %arg2[%c5_53, %c3_54] : memref<8x4xf32, #tpu.memory_space<smem>>
    %c6_55 = arith.constant 6 : index
    %c3_56 = arith.constant 3 : index
    %35 = memref.load %arg2[%c6_55, %c3_56] : memref<8x4xf32, #tpu.memory_space<smem>>
    %c7_57 = arith.constant 7 : index
    %c3_58 = arith.constant 3 : index
    %36 = memref.load %arg2[%c7_57, %c3_58] : memref<8x4xf32, #tpu.memory_space<smem>>
    %cst = arith.constant 0.000000e+00 : f32
    %37 = vector.broadcast %cst : f32 to vector<8x128xf32>
    %c0_i32 = arith.constant 0 : i32
    %38 = arith.subi %4, %c0_i32 : i32
    %39 = arith.addi %c0_i32, %38 : i32
    %c1_i32_59 = arith.constant 1 : i32
    %40 = scf.for %arg5 = %c0_i32 to %39 step %c1_i32_59 iter_args(%arg6 = %37) -> (vector<8x128xf32>)  : i32 {
      %c0_64 = arith.constant 0 : index
      %47 = arith.index_cast %arg5 : i32 to index
      %c0_65 = arith.constant 0 : index
      %c0_66 = arith.constant 0 : index
      %48 = vector.load %arg3[%c0_64, %47, %c0_65, %c0_66] : memref<3x1x8x128xf32, #tpu.memory_space<vmem>>, vector<1x1x8x128xf32>
      %49 = vector.shape_cast %48 : vector<1x1x8x128xf32> to vector<8x128xf32>
      %c1_67 = arith.constant 1 : index
      %50 = arith.index_cast %arg5 : i32 to index
      %c0_68 = arith.constant 0 : index
      %c0_69 = arith.constant 0 : index
      %51 = vector.load %arg3[%c1_67, %50, %c0_68, %c0_69] : memref<3x1x8x128xf32, #tpu.memory_space<vmem>>, vector<1x1x8x128xf32>
      %52 = vector.shape_cast %51 : vector<1x1x8x128xf32> to vector<8x128xf32>
      %c2_70 = arith.constant 2 : index
      %53 = arith.index_cast %arg5 : i32 to index
      %c0_71 = arith.constant 0 : index
      %c0_72 = arith.constant 0 : index
      %54 = vector.load %arg3[%c2_70, %53, %c0_71, %c0_72] : memref<3x1x8x128xf32, #tpu.memory_space<vmem>>, vector<1x1x8x128xf32>
      %55 = vector.shape_cast %54 : vector<1x1x8x128xf32> to vector<8x128xf32>
      %56 = arith.mulf %49, %49 : vector<8x128xf32>
      %57 = arith.mulf %52, %52 : vector<8x128xf32>
      %58 = arith.addf %56, %57 : vector<8x128xf32>
      %59 = arith.mulf %55, %55 : vector<8x128xf32>
      %60 = arith.addf %58, %59 : vector<8x128xf32>
      %61 = vector.broadcast %5 : f32 to vector<8x128xf32>
      %62 = arith.mulf %49, %61 : vector<8x128xf32>
      %63 = vector.broadcast %6 : f32 to vector<8x128xf32>
      %64 = arith.mulf %52, %63 : vector<8x128xf32>
      %65 = arith.addf %62, %64 : vector<8x128xf32>
      %66 = vector.broadcast %7 : f32 to vector<8x128xf32>
      %67 = arith.mulf %55, %66 : vector<8x128xf32>
      %68 = arith.addf %65, %67 : vector<8x128xf32>
      %69 = vector.broadcast %29 : f32 to vector<8x128xf32>
      %70 = arith.addf %68, %69 : vector<8x128xf32>
      %71 = vector.broadcast %8 : f32 to vector<8x128xf32>
      %72 = arith.mulf %49, %71 : vector<8x128xf32>
      %73 = vector.broadcast %9 : f32 to vector<8x128xf32>
      %74 = arith.mulf %52, %73 : vector<8x128xf32>
      %75 = arith.addf %72, %74 : vector<8x128xf32>
      %76 = vector.broadcast %10 : f32 to vector<8x128xf32>
      %77 = arith.mulf %55, %76 : vector<8x128xf32>
      %78 = arith.addf %75, %77 : vector<8x128xf32>
      %79 = vector.broadcast %30 : f32 to vector<8x128xf32>
      %80 = arith.addf %78, %79 : vector<8x128xf32>
      %81 = arith.minimumf %70, %80 : vector<8x128xf32>
      %82 = vector.broadcast %11 : f32 to vector<8x128xf32>
      %83 = arith.mulf %49, %82 : vector<8x128xf32>
      %84 = vector.broadcast %12 : f32 to vector<8x128xf32>
      %85 = arith.mulf %52, %84 : vector<8x128xf32>
      %86 = arith.addf %83, %85 : vector<8x128xf32>
      %87 = vector.broadcast %13 : f32 to vector<8x128xf32>
      %88 = arith.mulf %55, %87 : vector<8x128xf32>
      %89 = arith.addf %86, %88 : vector<8x128xf32>
      %90 = vector.broadcast %31 : f32 to vector<8x128xf32>
      %91 = arith.addf %89, %90 : vector<8x128xf32>
      %92 = arith.minimumf %81, %91 : vector<8x128xf32>
      %93 = vector.broadcast %14 : f32 to vector<8x128xf32>
      %94 = arith.mulf %49, %93 : vector<8x128xf32>
      %95 = vector.broadcast %15 : f32 to vector<8x128xf32>
      %96 = arith.mulf %52, %95 : vector<8x128xf32>
      %97 = arith.addf %94, %96 : vector<8x128xf32>
      %98 = vector.broadcast %16 : f32 to vector<8x128xf32>
      %99 = arith.mulf %55, %98 : vector<8x128xf32>
      %100 = arith.addf %97, %99 : vector<8x128xf32>
      %101 = vector.broadcast %32 : f32 to vector<8x128xf32>
      %102 = arith.addf %100, %101 : vector<8x128xf32>
      %103 = arith.minimumf %92, %102 : vector<8x128xf32>
      %104 = vector.broadcast %17 : f32 to vector<8x128xf32>
      %105 = arith.mulf %49, %104 : vector<8x128xf32>
      %106 = vector.broadcast %18 : f32 to vector<8x128xf32>
      %107 = arith.mulf %52, %106 : vector<8x128xf32>
      %108 = arith.addf %105, %107 : vector<8x128xf32>
      %109 = vector.broadcast %19 : f32 to vector<8x128xf32>
      %110 = arith.mulf %55, %109 : vector<8x128xf32>
      %111 = arith.addf %108, %110 : vector<8x128xf32>
      %112 = vector.broadcast %33 : f32 to vector<8x128xf32>
      %113 = arith.addf %111, %112 : vector<8x128xf32>
      %114 = arith.minimumf %103, %113 : vector<8x128xf32>
      %115 = vector.broadcast %20 : f32 to vector<8x128xf32>
      %116 = arith.mulf %49, %115 : vector<8x128xf32>
      %117 = vector.broadcast %21 : f32 to vector<8x128xf32>
      %118 = arith.mulf %52, %117 : vector<8x128xf32>
      %119 = arith.addf %116, %118 : vector<8x128xf32>
      %120 = vector.broadcast %22 : f32 to vector<8x128xf32>
      %121 = arith.mulf %55, %120 : vector<8x128xf32>
      %122 = arith.addf %119, %121 : vector<8x128xf32>
      %123 = vector.broadcast %34 : f32 to vector<8x128xf32>
      %124 = arith.addf %122, %123 : vector<8x128xf32>
      %125 = arith.minimumf %114, %124 : vector<8x128xf32>
      %126 = vector.broadcast %23 : f32 to vector<8x128xf32>
      %127 = arith.mulf %49, %126 : vector<8x128xf32>
      %128 = vector.broadcast %24 : f32 to vector<8x128xf32>
      %129 = arith.mulf %52, %128 : vector<8x128xf32>
      %130 = arith.addf %127, %129 : vector<8x128xf32>
      %131 = vector.broadcast %25 : f32 to vector<8x128xf32>
      %132 = arith.mulf %55, %131 : vector<8x128xf32>
      %133 = arith.addf %130, %132 : vector<8x128xf32>
      %134 = vector.broadcast %35 : f32 to vector<8x128xf32>
      %135 = arith.addf %133, %134 : vector<8x128xf32>
      %136 = arith.minimumf %125, %135 : vector<8x128xf32>
      %137 = vector.broadcast %26 : f32 to vector<8x128xf32>
      %138 = arith.mulf %49, %137 : vector<8x128xf32>
      %139 = vector.broadcast %27 : f32 to vector<8x128xf32>
      %140 = arith.mulf %52, %139 : vector<8x128xf32>
      %141 = arith.addf %138, %140 : vector<8x128xf32>
      %142 = vector.broadcast %28 : f32 to vector<8x128xf32>
      %143 = arith.mulf %55, %142 : vector<8x128xf32>
      %144 = arith.addf %141, %143 : vector<8x128xf32>
      %145 = vector.broadcast %36 : f32 to vector<8x128xf32>
      %146 = arith.addf %144, %145 : vector<8x128xf32>
      %147 = arith.minimumf %136, %146 : vector<8x128xf32>
      %148 = arith.addf %60, %147 : vector<8x128xf32>
      %cst_73 = arith.constant 9.99999997E-7 : f32
      %149 = vector.broadcast %cst_73 : f32 to vector<8x128xf32>
      %150 = arith.maximumf %148, %149 : vector<8x128xf32>
      %151 = math.sqrt %150 : vector<8x128xf32>
      %152 = arith.addf %arg6, %151 : vector<8x128xf32>
      scf.yield %152 : vector<8x128xf32>
    }
    %c0_i32_60 = arith.constant 0 : i32
    %41 = arith.cmpi eq, %arg1, %c0_i32_60 : i32
    %42 = arith.extui %41 : i1 to i32
    %c0_i32_61 = arith.constant 0 : i32
    %43 = arith.cmpi ne, %42, %c0_i32_61 : i32
    scf.if %43 {
      %c0_64 = arith.constant 0 : index
      %c0_65 = arith.constant 0 : index
      %47 = vector.load %arg4[%c0_64, %c0_65] : memref<8x128xf32, #tpu.memory_space<vmem>>, vector<8x128xf32>
      tpu.vector_store %arg4[%c0_64, %c0_65], %40 {strides = array<i32>} : memref<8x128xf32, #tpu.memory_space<vmem>>, vector<8x128xf32>,
    } else {
    }
    %c0_i32_62 = arith.constant 0 : i32
    %44 = arith.cmpi sgt, %arg1, %c0_i32_62 : i32
    %45 = arith.extui %44 : i1 to i32
    %c0_i32_63 = arith.constant 0 : i32
    %46 = arith.cmpi ne, %45, %c0_i32_63 : i32
    scf.if %46 {
      %c0_64 = arith.constant 0 : index
      %c0_65 = arith.constant 0 : index
      %47 = vector.load %arg4[%c0_64, %c0_65] : memref<8x128xf32, #tpu.memory_space<vmem>>, vector<8x128xf32>
      %48 = arith.addf %47, %40 : vector<8x128xf32>
      %c0_66 = arith.constant 0 : index
      %c0_67 = arith.constant 0 : index
      %49 = vector.load %arg4[%c0_66, %c0_67] : memref<8x128xf32, #tpu.memory_space<vmem>>, vector<8x128xf32>
      tpu.vector_store %arg4[%c0_66, %c0_67], %48 {strides = array<i32>} : memref<8x128xf32, #tpu.memory_space<vmem>>, vector<8x128xf32>,
    } else {
    }
    return
  }
  func.func @transform_0(%arg0: i32, %arg1: i32) -> (i32, i32) {
    %c0_i32 = arith.constant 0 : i32
    %c0_i32_0 = arith.constant 0 : i32
    %c0_i32_1 = arith.constant 0 : i32
    return %c0_i32, %c0_i32_0 : i32, i32
  }
  func.func @transform_1(%arg0: i32, %arg1: i32) -> (i32, i32, i32, i32) {
    %c1_i32 = arith.constant 1 : i32
    %0 = arith.muli %arg0, %c1_i32 : i32
    %1 = arith.addi %0, %arg1 : i32
    %c0_i32 = arith.constant 0 : i32
    %c0_i32_0 = arith.constant 0 : i32
    %c0_i32_1 = arith.constant 0 : i32
    %c0_i32_2 = arith.constant 0 : i32
    return %c0_i32, %1, %c0_i32_0, %c0_i32_1 : i32, i32, i32, i32
  }
  func.func @transform_2(%arg0: i32, %arg1: i32) -> (i32, i32) {
    %c0_i32 = arith.constant 0 : i32
    %c0_i32_0 = arith.constant 0 : i32
    return %arg0, %c0_i32 : i32, i32
  }
}

</mosaic_0001>

<bundles_post_ra>
// kernel: tpu_custom_call.1
= control target key start
LH: loop header
LB: loop body
LE: loop exit
PB: predicated region body
PF: predicated region fallthrough
CT: control target
= control target key end

     0   :  { %s574_s0 = inlined_call_operand.vmem [shape: f32[8,4], index: 0, kind: input, shape index: {}]   ;;  %s575_s1 = inlined_call_operand.hbm [shape: f32[3,1,8,128], index: 1, kind: input, shape index: {}]   ;;  %s576_s2 = inlined_call_operand.hbm [shape: f32[8,128], index: 2, kind: output, shape index: {}]  }
   0x1   :  { %578 = sst [smem:[#allocation17_spill]] %s576_s2 }
   0x2   :  { %7 = vsyncpa [#allocation5], 0 }
   0x3   :  { %8 = vsyncpa [#allocation3], 0 }
   0x4   :  { %9 = vsyncpa [#allocation4], 0  ;;  %s16_s11 = sshll.u32 %s574_s0, 4  ;;  %s17_s11 = int_to_ptr.vmem [resolvable:$true] %s16_s11 }
   0x5   :  { %s300_s12 = scalar_lea.vmem %s17_s11, 128  ;;  %p305_p1 = scmp.lt.s32.totalorder %s17_s11, %s17_s11 }
   0x6   :  { %p301_p0 = scmp.ne.s32.totalorder %s17_s11, %s300_s12  ;;  %p306_p2 = scmp.lt.s32.totalorder %s300_s12, %s300_s12 }
   0x8   :  { %p307_p3 = por %p306_p2, %p305_p1 }
   0xa   :  { %p308_p4 = pnand %p307_p3, %p301_p0 }
   0xc   :  { %311 = shalt.err (!%p308_p4)
}
   0xd   :  { %s378_s13 = smov [#allocation2]   ;;  %s379_s14 = smov [#allocation6]  }
   0xe   :  { %19 = dma.vmem_to_smem %s17_s11, 128, %s378_s13, [#allocation5]  }
   0xf   :  { %s28_s15 = sshll.u32 %s379_s14, 4  ;;  %s312_s18 = scalar_lea.hbm %s575_s1, 384  ;;  %s29_s15 = int_to_ptr.vmem [resolvable:$true] %s28_s15 }
  0x10   :  { %p313_p5 = scmp.ne.s32.totalorder %s575_s1, %s312_s18  ;;  %p316_p6 = scmp.lt.u32.totalorder %s312_s18, %s575_s1 }
  0x12   :  { %p318_p7 = pnand %p316_p6, %p313_p5 }
  0x14   :  { %321 = shalt.err (!%p318_p7)
}
  0x15   :  { %s322_s22 = scalar_lea.vmem %s29_s15, 384  ;;  %p327_p9 = scmp.lt.s32.totalorder %s29_s15, %s29_s15 }
  0x16   :  { %p323_p8 = scmp.ne.s32.totalorder %s29_s15, %s322_s22  ;;  %p328_p10 = scmp.lt.s32.totalorder %s322_s22, %s322_s22 }
  0x18   :  { %p329_p11 = por %p328_p10, %p327_p9 }
  0x1a   :  { %p330_p12 = pnand %p329_p11, %p323_p8 }
  0x1c   :  { %333 = shalt.err (!%p330_p12)
}
  0x1d   :  { %s380_s23 = smov 128   ;;  %s381_s24 = smov 8  }
  0x1e   :  { %34 = dma.hbm_to_vmem [thread:$0]  %s575_s1, 384, %s29_s15, [#allocation3], %s380_s23, %s380_s23, %s381_s24  }
  0x1f   :  { %364 = dma.done.wait [#allocation5], 128  }
  0x20   :  { %365 = vsyncadd [#allocation5], 4294967168 }
  0x21   :  { %366 = dma.done.wait [#allocation3], 384  }
  0x22   :  { %367 = vsyncadd [#allocation3], 4294966912 }
  0x23   :  { %41 = sfence }
  0x24   :  { %s413_s27 = sld [smem:[#allocation2]]  ;;  %s415_s28 = sld [smem:[#allocation2 + $0x1]]  ;;  %v477_v0 = vmov 0.0  }
  0x25   :  { %s417_s29 = sld [smem:[#allocation2 + $0x2]]  ;;  %s419_s30 = sld [smem:[#allocation2 + $0x80]] }
  0x26   :  { %s421_s3 = sld [smem:[#allocation2 + $0x81]]  ;;  %s423_s4 = sld [smem:[#allocation2 + $0x82]] }
  0x27   :  { %s425_s5 = sld [smem:[#allocation2 + $0x100]]  ;;  %s427_s1 = sld [smem:[#allocation2 + $0x101]] }
  0x28   :  { %s429_s6 = sld [smem:[#allocation2 + $0x102]]  ;;  %s431_s7 = sld [smem:[#allocation2 + $0x180]] }
  0x29   :  { %s433_s8 = sld [smem:[#allocation2 + $0x181]]  ;;  %s435_s9 = sld [smem:[#allocation2 + $0x182]] }
  0x2a   :  { %s437_s10 = sld [smem:[#allocation2 + $0x200]]  ;;  %s439_s11 = sld [smem:[#allocation2 + $0x201]] }
  0x2b   :  { %s441_s12 = sld [smem:[#allocation2 + $0x202]]  ;;  %s443_s13 = sld [smem:[#allocation2 + $0x280]] }
  0x2c   :  { %579 = sst [smem:[#allocation11_spill]] %s421_s3  ;;  %s445_s14 = sld [smem:[#allocation2 + $0x281]] }
  0x2d   :  { %580 = sst [smem:[#allocation12_spill]] %s427_s1  ;;  %s447_s15 = sld [smem:[#allocation2 + $0x282]] }
  0x2e   :  { %s449_s16 = sld [smem:[#allocation2 + $0x300]]  ;;  %s451_s17 = sld [smem:[#allocation2 + $0x301]] }
  0x2f   :  { %s453_s18 = sld [smem:[#allocation2 + $0x302]]  ;;  %s455_s19 = sld [smem:[#allocation2 + $0x380]] }
  0x30   :  { %s457_s20 = sld [smem:[#allocation2 + $0x381]]  ;;  %s459_s0 = sld [smem:[#allocation2 + $0x382]] }
  0x31   :  { %s461_s21 = sld [smem:[#allocation2 + $0x3]] }
  0x32   :  { %s463_s22 = sld [smem:[#allocation2 + $0x83]] }
  0x33   :  { %s465_s23 = sld [smem:[#allocation2 + $0x103]] }
  0x34   :  { %s467_s24 = sld [smem:[#allocation2 + $0x183]] }
  0x35   :  { %581 = sst [smem:[#allocation13_spill]] %s453_s18  ;;  %s469_s25 = sld [smem:[#allocation2 + $0x203]] }
  0x36   :  { %582 = sst [smem:[#allocation14_spill]] %s457_s20  ;;  %s479_s20 = smov 0  }
  0x37   :  { %583 = sst [smem:[#allocation15_spill]] %s459_s0  ;;  %s471_s26 = sld [smem:[#allocation2 + $0x283]] }
  0x38   :  { %s473_s2 = sld [smem:[#allocation2 + $0x303]] }
  0x39   :  { %s475_s18 = sld [smem:[#allocation2 + $0x383]] }
  0x3f   :  { %584 = sst [smem:[#allocation16_spill]] %s475_s18 }
  0x40 LB: > { %s585_s3 = sld [smem:[#allocation11_spill]]  ;;  %s586_s1 = sld [smem:[#allocation12_spill]]  ;;  %v100_v1 = vstv %s413_s27  ;;  %v102_v2 = vstv %s415_s28  ;;  %v105_v3 = vstv %s417_s29  ;;  %v108_v4 = vstv %s461_s21  ;;  %s376_s20 = sphi %s479_s20, %s82_s20   ;;  %v372_v0 = vphi %v477_v0, %v591_v0  }
  0x41   : > { %s272_s18 = sshll.u32 %s376_s20, 3  ;;  %v110_v5 = vstv %s419_s30  ;;  %v115_v7 = vstv %s423_s4  ;;  %v118_v8 = vstv %s463_s22  ;;  %v121_v9 = vstv %s425_s5  ;;  %s82_s20 = sadd.s32 1, %s376_s20  }
  0x42   : > { %s87_s0 = scalar_lea.vmem [#allocation6], %s272_s18  ;;  %v126_v14 = vstv %s429_s6  ;;  %v132_v16 = vstv %s431_s7  ;;  %v134_v17 = vstv %s433_s8  ;;  %v137_v18 = vstv %s435_s9  ;;  %s587_s18 = sld [smem:[#allocation13_spill]] }
  0x43   : > { %v498_v11 = vld [vmem:[%s87_s0] sm:$0xff]  ;;  %v500_v12 = vld [vmem:[%s87_s0 + $0x8] sm:$0xff]  ;;  %v502_v13 = vld [vmem:[%s87_s0 + $0x10] sm:$0xff]  ;;  %v129_v26 = vstv %s465_s23  ;;  %s588_s0 = sld [smem:[#allocation14_spill]]  ;;  %p81_p13 = scmp.ge.s32.totalorder %s82_s20, 1 }
  0x44   : > { %v101_v15 = vmul.f32 %v100_v1, %v498_v11  ;;  %v103_v19 = vmul.f32 %v500_v12, %v102_v2  ;;  %v106_v20 = vmul.f32 %v502_v13, %v105_v3  ;;  %v111_v21 = vmul.f32 %v110_v5, %v498_v11 }
  0x45   : > { %v116_v23 = vmul.f32 %v502_v13, %v115_v7  ;;  %v122_v24 = vmul.f32 %v121_v9, %v498_v11  ;;  %v127_v29 = vmul.f32 %v502_v13, %v126_v14  ;;  %v133_v30 = vmul.f32 %v132_v16, %v498_v11 }
  0x46   : > { %v112_v6 = vstv %s585_s3  ;;  %v123_v10 = vstv %s586_s1  ;;  %v104_v27 = vadd.f32 %v103_v19, %v101_v15  ;;  %v95_v31 = vmul.f32 %v498_v11, %v498_v11  ;;  %s589_s1 = sld [smem:[#allocation15_spill]]  ;;  %s590_s3 = sld [smem:[#allocation16_spill]] }
  0x47   : > { %v113_v22 = vmul.f32 %v500_v12, %v112_v6  ;;  %v124_v25 = vmul.f32 %v500_v12, %v123_v10  ;;  %v135_v33 = vmul.f32 %v500_v12, %v134_v17  ;;  %v138_v34 = vmul.f32 %v502_v13, %v137_v18 }
  0x48   : > { %v107_v35 = vadd.f32 %v106_v20, %v104_v27  ;;  %v140_v37 = vstv %s467_s24  ;;  %v143_v38 = vstv %s437_s10  ;;  %v145_v42 = vstv %s439_s11 }
  0x49   : > { %v114_v28 = vadd.f32 %v113_v22, %v111_v21  ;;  %v125_v32 = vadd.f32 %v124_v25, %v122_v24  ;;  %v136_v40 = vadd.f32 %v135_v33, %v133_v30  ;;  %v144_v41 = vmul.f32 %v143_v38, %v498_v11 }
  0x4a   : > { %v109_v43 = vadd.f32 %v108_v4, %v107_v35  ;;  %v146_v45 = vmul.f32 %v500_v12, %v145_v42  ;;  %v148_v46 = vstv %s441_s12  ;;  %v151_v50 = vstv %s469_s25 }
  0x4b   : > { %v117_v36 = vadd.f32 %v116_v23, %v114_v28  ;;  %v128_v39 = vadd.f32 %v127_v29, %v125_v32  ;;  %v139_v48 = vadd.f32 %v138_v34, %v136_v40  ;;  %v149_v49 = vmul.f32 %v502_v13, %v148_v46 }
  0x4c   : > { %v147_v52 = vadd.f32 %v146_v45, %v144_v41  ;;  %v154_v53 = vstv %s443_s13  ;;  %v156_v54 = vstv %s445_s14  ;;  %v159_v58 = vstv %s447_s15 }
  0x4d   : > { %v119_v44 = vadd.f32 %v118_v8, %v117_v36  ;;  %v130_v47 = vadd.f32 %v129_v26, %v128_v39  ;;  %v141_v55 = vadd.f32 %v140_v37, %v139_v48  ;;  %v155_v56 = vmul.f32 %v154_v53, %v498_v11 }
  0x4e   : > { %v157_v57 = vmul.f32 %v500_v12, %v156_v54  ;;  %v150_v60 = vadd.f32 %v149_v49, %v147_v52  ;;  %v160_v61 = vmul.f32 %v502_v13, %v159_v58  ;;  %v162_v62 = vstv %s471_s26 }
  0x4f   : > { %v120_v51 = vmin.f32 %v109_v43, %v119_v44  ;;  %v165_v1 = vstv %s449_s16  ;;  %v167_v2 = vstv %s451_s17  ;;  %v170_v3 = vstv %s587_s18 }
  0x50   : > { %v158_v63 = vadd.f32 %v157_v57, %v155_v56  ;;  %v152_v5 = vadd.f32 %v151_v50, %v150_v60  ;;  %v166_v6 = vmul.f32 %v165_v1, %v498_v11  ;;  %v168_v7 = vmul.f32 %v500_v12, %v167_v2 }
  0x51   : > { %v131_v59 = vmin.f32 %v120_v51, %v130_v47  ;;  %v96_v8 = vmul.f32 %v500_v12, %v500_v12  ;;  %v171_v10 = vmul.f32 %v502_v13, %v170_v3  ;;  %v176_v14 = vstv %s455_s19 }
  0x52   : > { %v161_v9 = vadd.f32 %v160_v61, %v158_v63  ;;  %v169_v16 = vadd.f32 %v168_v7, %v166_v6  ;;  %v177_v17 = vmul.f32 %v176_v14, %v498_v11  ;;  %v178_v18 = vstv %s588_s0 }
  0x53   : > { %v142_v4 = vmin.f32 %v131_v59, %v141_v55  ;;  %v173_v20 = vstv %s473_s2  ;;  %v179_v21 = vmul.f32 %v500_v12, %v178_v18  ;;  %v181_v22 = vstv %s589_s1 }
  0x54   : > { %v163_v19 = vadd.f32 %v162_v62, %v161_v9  ;;  %v172_v23 = vadd.f32 %v171_v10, %v169_v16  ;;  %v182_v24 = vmul.f32 %v502_v13, %v181_v22  ;;  %v97_v25 = vadd.f32 %v96_v8, %v95_v31 }
  0x55   : > { %v153_v15 = vmin.f32 %v142_v4, %v152_v5  ;;  %v98_v26 = vmul.f32 %v502_v13, %v502_v13  ;;  %v180_v28 = vadd.f32 %v179_v21, %v177_v17  ;;  %v184_v30 = vstv %s590_s3  ;;  %s382_s3 = smov (%p81_p13), [#allocation7]  }
  0x56   : > { %v174_v29 = vadd.f32 %v173_v20, %v172_v23  ;;  %s215_s1 = sshll.u32 (%p81_p13), %s382_s3, 4  ;;  %s216_s1 = int_to_ptr.vmem [resolvable:$true] %s215_s1 }
  0x57   : > { %v164_v27 = vmin.f32 %v153_v15, %v163_v19  ;;  %v183_v32 = vadd.f32 %v182_v24, %v180_v28  ;;  %v99_v11 = vadd.f32 %v98_v26, %v97_v25  ;;  %s334_s18 = scalar_lea.vmem (%p81_p13), %s216_s1, 128  ;;  %p339_p1 = scmp.lt.s32.totalorder (%p81_p13), %s216_s1, %s216_s1 }
  0x58   :  { %p335_p0 = scmp.ne.s32.totalorder (%p81_p13), %s216_s1, %s334_s18  ;;  %p340_p2 = scmp.lt.s32.totalorder (%p81_p13), %s334_s18, %s334_s18 }
  0x59   : > { %v175_v33 = vmin.f32 %v164_v27, %v174_v29  ;;  %v185_v34 = vadd.f32 %v184_v30, %v183_v32 }
  0x5a   :  { %p341_p3 = por (%p81_p13), %p340_p2, %p339_p1 }
  0x5b   : > { %v186_v35 = vmin.f32 %v175_v33, %v185_v34 }
  0x5c   :  { %p342_p4 = pnand (%p81_p13), %p341_p3, %p335_p0 }
  0x5d   : > { %v187_v36 = vadd.f32 %v186_v35, %v99_v11 }
  0x5f   : > { %v188_v37 = vmax.f32 %v187_v36, 1e-06 }
  0x61   : > { %298 = vrsqrt.f32 %v188_v37  ;;  %vm191_vm0 = vcmp.eq.f32.partialorder %v188_v37, inf  ;;  %v194_v38 = vand.u32 2147483648, %v188_v37  ;;  %vm193_vm1 = vcmp.eq.f32.partialorder %v188_v37, 0.0 }
  0x6b   : > { %v299_v12 = vpop.eup %298 }
  0x6c   : > { %v190_v39 = vmul.f32 %v299_v12, %v188_v37  ;;  %84 = sbr.rel (!%p81_p13) target bundleno = 64 (0x40), region = 55 }
  0x6e   : > { %v192_v31 = vsel %vm191_vm0, %v188_v37, %v190_v39 }
  0x6f   : > { %v195_v40 = vsel %vm193_vm1, %v194_v38, %v192_v31 }
  0x70   : > { %v196_v13 = vadd.f32 %v372_v0, %v195_v40  }
  0x72   : > { %v591_v0 = vmov %v196_v13  ;;  %201 = vst [vmem:[#allocation7] sm:$0xff] (%p81_p13), %v196_v13 }
  0x73   :  { %345 = shalt.err (!%p342_p4)
}
  0x74   :  { %s592_s2 = sld [smem:[#allocation17_spill]] }
  0x7a   :  { %s346_s4 = scalar_lea.hbm %s592_s2, 128 }
  0x7b   :  { %p347_p5 = scmp.ne.s32.totalorder %s592_s2, %s346_s4  ;;  %p350_p6 = scmp.lt.u32.totalorder %s346_s4, %s592_s2 }
  0x7d   :  { %p352_p7 = pnand %p350_p6, %p347_p5 }
  0x7f   :  { %355 = shalt.err (!%p352_p7)
}
  0x80   :  { %218 = dma.vmem_to_hbm [thread:$0]  %s216_s1, 128, %s592_s2, [#allocation4]  }
  0x81   :  { %368 = dma.done.wait [#allocation4], 128  }
  0x82   :  { %369 = vsyncadd [#allocation4], 4294967168 }
  0x83   :  { %222 = vsyncpa [#allocation3], 1 }
  0x84   :  { %223 = vsyncpa [#allocation4], 1 }
  0x85   :  { %224 = vsyncpa [#allocation5], 1 }

</bundles_post_ra>
